<compile_context>
chip_gen: v5e
topology: v5e:2x2
jax: 0.10.0
libtpu: 0.0.40
codegen_flags: <defaults>
</compile_context>

<pallas_src>
import functools

import numpy as np
import jax
import jax.numpy as jnp
from jax import lax
from jax.experimental import pallas as pl
from jax.experimental.pallas import tpu as pltpu


def _round_up(x, m):
    return (x + m - 1) // m * m


def _vmem_limit_bytes(need_bytes):
    # Explicit scoped-VMEM limit: defaults are 16 MiB (v5e) / 32 MiB (v6e/v7x)
    # which the recurrence exceeds at production nhid.  Keep headroom for
    # Mosaic-internal scratch but stay below v7x's 64 MiB physical VMEM.
    return int(min(max(2 * need_bytes, 24 << 20), 48 << 20))


@functools.lru_cache(maxsize=None)
def _buffered_single_supported():
    """Explicit feature probe for BlockSpec(pipeline_mode=pl.Buffered(1)).

    A tiny throwaway kernel is compiled once; the real kernels are never
    wrapped in a blanket try/except, so genuine compile/VMEM errors surface.
    """
    if not hasattr(pl, "Buffered"):
        return False
    try:
        def _probe_kernel(x_ref, o_ref):
            o_ref[...] = x_ref[...] + 1.0

        fn = pl.pallas_call(
            _probe_kernel,
            out_shape=jax.ShapeDtypeStruct((16, 128), jnp.float32),
            grid=(2,),
            in_specs=[pl.BlockSpec((8, 128), lambda i: (0, 0),
                                   pipeline_mode=pl.Buffered(1))],
            out_specs=pl.BlockSpec((8, 128), lambda i: (i, 0)),
        )
        jax.block_until_ready(fn(jnp.zeros((8, 128), jnp.float32)))
        return True
    except Exception:
        return False


# ----------------------------------------------------------------------------
# Generic tiled (M,K)@(K,N) + bias kernel (MXU, bf16 operands, f32 accum).
# Used for the hoisted input->gates matmul of each LSTM layer and the decoder.
# ----------------------------------------------------------------------------
def _matmul_bias_kernel(x_ref, w_ref, b_ref, o_ref):
    acc = jnp.dot(x_ref[...], w_ref[...], preferred_element_type=jnp.float32)
    o_ref[...] = (acc + b_ref[...]).astype(o_ref.dtype)


def matmul_bias(x, w, b, *, out_dtype=jnp.float32, tm=512, tn=512):
    """x:(M,K)[bf16] @ w:(K,N)[bf16] + b:(1,N)[f32] -> (M,N)[out_dtype].

    Grid is (N-tiles, M-tiles): the weight block index only changes on the
    slow (outer) axis, so each weight tile is DMA'd from HBM exactly once and
    only the (much smaller) activation tile is re-streamed.
    """
    M, K = x.shape
    N = w.shape[1]
    tm = min(tm, _round_up(M, 8))       # sublane-aligned row tile
    tn = min(tn, _round_up(N, 128))     # lane-dense col tile
    Mp, Np = _round_up(M, tm), _round_up(N, tn)
    if Mp != M:
        x = jnp.pad(x, ((0, Mp - M), (0, 0)))
    if Np != N:
        w = jnp.pad(w, ((0, 0), (0, Np - N)))
        b = jnp.pad(b, ((0, 0), (0, Np - N)))

    need = 2 * (tm * K * x.dtype.itemsize
                + K * tn * w.dtype.itemsize
                + tn * b.dtype.itemsize
                + tm * tn * jnp.dtype(out_dtype).itemsize)

    out = pl.pallas_call(
        _matmul_bias_kernel,
        out_shape=jax.ShapeDtypeStruct((Mp, Np), out_dtype),
        grid=(Np // tn, Mp // tm),                 # j (weights) outer, i inner
        in_specs=[
            pl.BlockSpec((tm, K), lambda j, i: (i, 0)),
            pl.BlockSpec((K, tn), lambda j, i: (0, j)),
            pl.BlockSpec((1, tn), lambda j, i: (0, j)),
        ],
        out_specs=pl.BlockSpec((tm, tn), lambda j, i: (i, j)),
        compiler_params=pltpu.CompilerParams(
            dimension_semantics=("parallel", "parallel"),
            vmem_limit_bytes=_vmem_limit_bytes(need)),
    )(x, w, b)
    if (Mp, Np) != (M, N):
        out = out[:M, :N]
    return out


# ----------------------------------------------------------------------------
# LSTM recurrence kernel: grid over blocks of tb timesteps, per-gate recurrent
# dots, h/c carried in VMEM scratch, ragged-T tail masked.
# ----------------------------------------------------------------------------
def _lstm_rec_kernel(gx_ref, whh_ref, h0_ref, c0_ref,
                     hseq_ref, hfin_ref, cfin_ref,
                     h_sc, c_sc, *, hp, tb, t_valid):
    step = pl.program_id(0)

    @pl.when(step == 0)
    def _():
        h_sc[...] = h0_ref[...]
        c_sc[...] = c0_ref[...]

    def body(t, carry):
        h, c = carry
        h_b = h.astype(jnp.bfloat16)
        gx = gx_ref[t]                                   # (Bp, 4Hp) bf16

        def gate(k):
            # Per-gate (Hp, Hp) dot keeps the live gate footprint at (B, Hp)
            # instead of (B, 4Hp) (vreg-pressure fix).  Slices are 128-aligned.
            return (gx[:, k * hp:(k + 1) * hp].astype(jnp.float32)
                    + jnp.dot(h_b, whh_ref[:, k * hp:(k + 1) * hp],
                              preferred_element_type=jnp.float32))

        # PyTorch gate order i, f, g, o.
        i_g = jax.nn.sigmoid(gate(0))
        f_g = jax.nn.sigmoid(gate(1))
        g_g = jnp.tanh(gate(2))
        o_g = jax.nn.sigmoid(gate(3))
        c_new = f_g * c + i_g * g_g
        h_new = o_g * jnp.tanh(c_new)

        # Ragged tail: padded timesteps (>= t_valid) do not advance the state.
        valid = (step * tb + t) < t_valid
        h = jnp.where(valid, h_new, h)
        c = jnp.where(valid, c_new, c)
        hseq_ref[t] = h.astype(hseq_ref.dtype)
        return h, c

    h, c = lax.fori_loop(0, tb, body, (h_sc[...], c_sc[...]), unroll=True)
    h_sc[...] = h
    c_sc[...] = c

    @pl.when(step == pl.num_programs(0) - 1)
    def _():
        hfin_ref[...] = h
        cfin_ref[...] = c


def lstm_recurrence(gates_x, w_hh_t, h0, c0, *, tb, t_valid):
    """gates_x: (Tp, Bp, 4*Hp) bf16; w_hh_t: (Hp, 4*Hp) bf16; h0/c0: (Bp, Hp) f32."""
    Tp, Bp, G = gates_x.shape
    Hp = G // 4
    nsteps = Tp // tb
    kernel = functools.partial(_lstm_rec_kernel, hp=Hp, tb=tb, t_valid=t_valid)

    use_single_buffer = _buffered_single_supported()

    def const_spec(shape):
        # Constant-index inputs (weights / initial state): single-buffer to
        # halve their resident VMEM footprint when the feature is available.
        if use_single_buffer:
            return pl.BlockSpec(shape, lambda t: (0, 0),
                                pipeline_mode=pl.Buffered(1))
        return pl.BlockSpec(shape, lambda t: (0, 0))

    whh_bufs = 1 if use_single_buffer else 2
    state_bufs = 1 if use_single_buffer else 2
    need = (2 * tb * Bp * G * 2                  # gx blocks (bf16, 2 buffers)
            + whh_bufs * Hp * G * 2              # W_hh (bf16)
            + 2 * state_bufs * Bp * Hp * 4       # h0 / c0 (f32)
            + 2 * tb * Bp * Hp * 2               # hseq out blocks (bf16)
            + 2 * 2 * Bp * Hp * 4                # hfin / cfin out blocks (f32)
            + 2 * Bp * Hp * 4)                   # h/c scratch (f32)

    out_shapes = (
        jax.ShapeDtypeStruct((Tp, Bp, Hp), jnp.bfloat16),
        jax.ShapeDtypeStruct((Bp, Hp), jnp.float32),
        jax.ShapeDtypeStruct((Bp, Hp), jnp.float32),
    )
    return pl.pallas_call(
        kernel,
        out_shape=out_shapes,
        grid=(nsteps,),
        in_specs=[
            pl.BlockSpec((tb, Bp, G), lambda t: (t, 0, 0)),
            const_spec((Hp, G)),
            const_spec((Bp, Hp)),
            const_spec((Bp, Hp)),
        ],
        out_specs=[
            pl.BlockSpec((tb, Bp, Hp), lambda t: (t, 0, 0)),
            pl.BlockSpec((Bp, Hp), lambda t: (0, 0)),
            pl.BlockSpec((Bp, Hp), lambda t: (0, 0)),
        ],
        scratch_shapes=[
            pltpu.VMEM((Bp, Hp), jnp.float32),
            pltpu.VMEM((Bp, Hp), jnp.float32),
        ],
        compiler_params=pltpu.CompilerParams(
            dimension_semantics=("arbitrary",),
            vmem_limit_bytes=_vmem_limit_bytes(need)),
    )(gates_x, w_hh_t, h0, c0)


# ----------------------------------------------------------------------------
# Wrapper-side layout plumbing: pre-transpose weights, pad nhid -> multiple of
# 128 with gate-aligned columns, store matmul operands in bf16.
# ----------------------------------------------------------------------------
def _gate_pad_cols(m, h, hp):
    """(R, 4h) -> (R, 4hp): each of the 4 gate blocks starts at k*hp."""
    if hp == h:
        return m
    out = jnp.zeros((m.shape[0], 4 * hp), m.dtype)
    for k in range(4):
        out = out.at[:, k * hp:k * hp + h].set(m[:, k * h:(k + 1) * h])
    return out


def prepare_params(params, nhid):
    """One-time conversion of PyTorch-layout params into kernel-ready layout."""
    hp = _round_up(nhid, 128)
    bf = jnp.bfloat16
    prepped = {
        "encoder_weight": params["encoder_weight"].astype(bf),
        # decoder: store as (Hp, ntoken) bf16 so the kernel consumes it as (K, N).
        "decoder_w_t": jnp.pad(params["decoder_weight"].T,
                               ((0, hp - nhid), (0, 0))).astype(bf),
        "decoder_bias": params["decoder_bias"],          # f32
        "nhid": nhid,
        "hp": hp,
        "lstm": [],
    }
    for l, (w_ih, w_hh, bias) in enumerate(params["lstm"]):
        w_ih_t = _gate_pad_cols(w_ih.T, nhid, hp)            # (in_dim, 4Hp)
        if l > 0:
            # layers >= 1 consume the padded (T*B, Hp) hidden sequence
            w_ih_t = jnp.pad(w_ih_t, ((0, hp - nhid), (0, 0)))
        w_hh_t = jnp.pad(_gate_pad_cols(w_hh.T, nhid, hp),
                         ((0, hp - nhid), (0, 0)))           # (Hp, 4Hp)
        b_p = _gate_pad_cols(bias, nhid, hp)                 # (1, 4Hp) f32
        prepped["lstm"].append((w_ih_t.astype(bf), w_hh_t.astype(bf), b_p))
    return prepped


# ----------------------------------------------------------------------------
# Full RNNModel forward.
# ----------------------------------------------------------------------------
def rnn_model_forward(tokens, hidden, prepped, *, tb=8):
    """tokens: (T, B) int32; hidden: (h0, c0) each (nlayers, B, nhid)."""
    h0_all, c0_all = hidden
    T, B = tokens.shape
    H, Hp = prepped["nhid"], prepped["hp"]
    Bp = _round_up(B, 8)                 # full-sublane batch
    Tp = _round_up(T, tb)                # ragged tail handled in-kernel

    # Encoder: embedding gather (plain-JAX glue), bf16 activations.
    emb = jnp.take(prepped["encoder_weight"], tokens, axis=0)   # (T, B, ninp)
    # self.drop(emb): identity (eval mode).
    if (Tp, Bp) != (T, B):
        emb = jnp.pad(emb, ((0, Tp - T), (0, Bp - B), (0, 0)))

    x_flat = emb.reshape(Tp * Bp, emb.shape[-1])
    h_fin, c_fin = [], []
    for l, (w_ih_t, w_hh_t, b_p) in enumerate(prepped["lstm"]):
        # Hoisted input-side matmul for ALL timesteps; bias folded in once;
        # gates emitted in bf16 to halve the HBM round trip.
        gates_x = matmul_bias(x_flat, w_ih_t, b_p, out_dtype=jnp.bfloat16)
        gates_x = gates_x.reshape(Tp, Bp, 4 * Hp)
        h0 = jnp.pad(h0_all[l], ((0, Bp - B), (0, Hp - H)))
        c0 = jnp.pad(c0_all[l], ((0, Bp - B), (0, Hp - H)))
        h_seq, h_T, c_T = lstm_recurrence(gates_x, w_hh_t, h0, c0,
                                          tb=tb, t_valid=T)
        # Inter-layer dropout: identity (eval mode).
        x_flat = h_seq.reshape(Tp * Bp, Hp)
        h_fin.append(h_T[:B, :H])
        c_fin.append(c_T[:B, :H])

    # self.drop(output): identity (eval mode).  Decoder (weight streamed once).
    decoded = matmul_bias(x_flat, prepped["decoder_w_t"],
                          prepped["decoder_bias"], out_dtype=jnp.float32)
    decoded = decoded.reshape(Tp, Bp, -1)[:T, :B]
    return decoded, (jnp.stack(h_fin, 0), jnp.stack(c_fin, 0))


# ----------------------------------------------------------------------------
# Deterministic parameter init (matches shapes / init of the PyTorch module).
# ----------------------------------------------------------------------------
def init_params(key, ntoken, ninp, nhid, nlayers):
    keys = jax.random.split(key, 2 + 4 * nlayers)
    initrange = 0.1
    params = {
        "encoder_weight": jax.random.uniform(
            keys[0], (ntoken, ninp), jnp.float32, -initrange, initrange),
        "decoder_weight": jax.random.uniform(
            keys[1], (ntoken, nhid), jnp.float32, -initrange, initrange),
        "decoder_bias": jnp.zeros((1, ntoken), jnp.float32),
        "lstm": [],
    }
    stdv = 1.0 / (nhid ** 0.5)
    for l in range(nlayers):
        in_dim = ninp if l == 0 else nhid
        k = keys[2 + 4 * l: 2 + 4 * (l + 1)]
        w_ih = jax.random.uniform(k[0], (4 * nhid, in_dim), jnp.float32, -stdv, stdv)
        w_hh = jax.random.uniform(k[1], (4 * nhid, nhid), jnp.float32, -stdv, stdv)
        b_ih = jax.random.uniform(k[2], (4 * nhid,), jnp.float32, -stdv, stdv)
        b_hh = jax.random.uniform(k[3], (4 * nhid,), jnp.float32, -stdv, stdv)
        bias = (b_ih + b_hh).reshape(1, 4 * nhid)
        params["lstm"].append((w_ih, w_hh, bias))
    return params


# ----------------------------------------------------------------------------
# Pure-JAX reference (no Pallas, no padding).  It mirrors the kernel's bf16
# operand quantization / f32 accumulation so the check validates the Pallas
# plumbing rather than bf16-vs-f32 rounding.
# ----------------------------------------------------------------------------
def reference_forward(tokens, hidden, params, nhid):
    h0_all, c0_all = hidden
    bf = jnp.bfloat16
    emb = jnp.take(params["encoder_weight"], tokens, axis=0)
    x = emb.astype(bf)
    h_fin, c_fin = [], []
    for l, (w_ih, w_hh, bias) in enumerate(params["lstm"]):
        w_ih_b, w_hh_b = w_ih.astype(bf), w_hh.astype(bf)
        h, c = h0_all[l], c0_all[l]
        outs = []
        for t in range(x.shape[0]):
            gx = (jnp.dot(x[t], w_ih_b.T, preferred_element_type=jnp.float32)
                  + bias[0]).astype(bf)                       # bf16 gates_x
            g = gx.astype(jnp.float32) + jnp.dot(
                h.astype(bf), w_hh_b.T, preferred_element_type=jnp.float32)
            i_g = jax.nn.sigmoid(g[:, :nhid])
            f_g = jax.nn.sigmoid(g[:, nhid:2 * nhid])
            g_g = jnp.tanh(g[:, 2 * nhid:3 * nhid])
            o_g = jax.nn.sigmoid(g[:, 3 * nhid:])
            c = f_g * c + i_g * g_g
            h = o_g * jnp.tanh(c)
            outs.append(h.astype(bf))                         # bf16 hidden seq
        x = jnp.stack(outs, 0)
        h_fin.append(h)
        c_fin.append(c)
    dec = (jnp.dot(x.reshape(-1, nhid), params["decoder_weight"].astype(bf).T,
                   preferred_element_type=jnp.float32)
           + params["decoder_bias"][0])
    return (dec.reshape(x.shape[0], x.shape[1], -1),
            (jnp.stack(h_fin, 0), jnp.stack(c_fin, 0)))


if __name__ == "__main__":
    # Small shapes: seq=8, batch=2, ntoken=128, ninp=32, nhid=32, nlayers=2.
    T, B = 8, 2
    ntoken, ninp, nhid, nlayers = 128, 32, 32, 2

    key = jax.random.PRNGKey(0)
    k_tok, k_par = jax.random.split(key)

    params = init_params(k_par, ntoken, ninp, nhid, nlayers)
    prepped = prepare_params(params, nhid)

    tokens = jax.random.randint(k_tok, (T, B), 0, ntoken, dtype=jnp.int32)
    # init_hidden(bsz): zeros
    h0 = jnp.zeros((nlayers, B, nhid), jnp.float32)
    c0 = jnp.zeros((nlayers, B, nhid), jnp.float32)

    decoded, (h_n, c_n) = rnn_model_forward(tokens, (h0, c0), prepped)
    jax.block_until_ready((decoded, h_n, c_n))

    assert decoded.shape == (T, B, ntoken)
    assert h_n.shape == (nlayers, B, nhid) and c_n.shape == (nlayers, B, nhid)

    # Numerical check against the (bf16-mirrored) pure-JAX reference.
    ref_dec, (ref_h, ref_c) = reference_forward(tokens, (h0, c0), params, nhid)
    np.testing.assert_allclose(np.asarray(decoded), np.asarray(ref_dec),
                               rtol=2e-3, atol=2e-3)
    np.testing.assert_allclose(np.asarray(h_n), np.asarray(ref_h),
                               rtol=2e-3, atol=2e-3)
    np.testing.assert_allclose(np.asarray(c_n), np.asarray(ref_c),
                               rtol=2e-3, atol=2e-3)

    print("KERNEL_OK")
</pallas_src>

<mosaic_0001>
module attributes {stable_mosaic.version = 11 : i64} {
  func.func @_matmul_bias_kernel(%arg0: i32, %arg1: i32, %arg2: memref<64x32xbf16, #tpu.memory_space<vmem>>, %arg3: memref<32x512xbf16, #tpu.memory_space<vmem>>, %arg4: memref<1x512xf32, #tpu.memory_space<vmem>>, %arg5: memref<64x512xbf16, #tpu.memory_space<vmem>>) attributes {dimension_semantics = [#tpu.dimension_semantics<parallel>, #tpu.dimension_semantics<parallel>], iteration_bounds = array<i64: 1, 1>, scalar_prefetch = 0 : i64, scratch_operands = 0 : i64, tpu.core_type = #tpu.core_type<tc>, window_params = [{transform_indices = @transform_0, window_bounds = array<i64: 64, 32>}, {transform_indices = @transform_1, window_bounds = array<i64: 32, 512>}, {transform_indices = @transform_2, window_bounds = array<i64: 1, 512>}, {transform_indices = @transform_3, window_bounds = array<i64: 64, 512>}]} {
    %c0 = arith.constant 0 : index
    %c0_0 = arith.constant 0 : index
    %0 = vector.load %arg2[%c0, %c0_0] : memref<64x32xbf16, #tpu.memory_space<vmem>>, vector<64x32xbf16>
    %c0_1 = arith.constant 0 : index
    %c0_2 = arith.constant 0 : index
    %1 = vector.load %arg3[%c0_1, %c0_2] : memref<32x512xbf16, #tpu.memory_space<vmem>>, vector<32x512xbf16>
    %cst = arith.constant dense<0.000000e+00> : vector<64x512xf32>
    %2 = tpu.matmul %0, %1, %cst {dimension_numbers = #tpu.dot_dimension_numbers<[1], [0], [0], [1], [0, 0, 1, 1], [], []>} : vector<64x32xbf16>, vector<32x512xbf16>, vector<64x512xf32> -> vector<64x512xf32>
    %c0_3 = arith.constant 0 : index
    %c0_4 = arith.constant 0 : index
    %3 = vector.load %arg4[%c0_3, %c0_4] : memref<1x512xf32, #tpu.memory_space<vmem>>, vector<1x512xf32>
    %4 = vector.broadcast %3 : vector<1x512xf32> to vector<64x512xf32>
    %5 = arith.addf %2, %4 : vector<64x512xf32>
    %6 = arith.truncf %5 : vector<64x512xf32> to vector<64x512xbf16>
    %c0_5 = arith.constant 0 : index
    %c0_6 = arith.constant 0 : index
    %7 = vector.load %arg5[%c0_5, %c0_6] : memref<64x512xbf16, #tpu.memory_space<vmem>>, vector<64x512xbf16>
    tpu.vector_store %arg5[%c0_5, %c0_6], %6 {strides = array<i32>} : memref<64x512xbf16, #tpu.memory_space<vmem>>, vector<64x512xbf16>,
    return
  }
  func.func @transform_0(%arg0: i32, %arg1: i32) -> (i32, i32) {
    %c0_i32 = arith.constant 0 : i32
    %c0_i32_0 = arith.constant 0 : i32
    return %arg1, %c0_i32 : i32, i32
  }
  func.func @transform_1(%arg0: i32, %arg1: i32) -> (i32, i32) {
    %c0_i32 = arith.constant 0 : i32
    %c0_i32_0 = arith.constant 0 : i32
    return %c0_i32, %arg0 : i32, i32
  }
  func.func @transform_2(%arg0: i32, %arg1: i32) -> (i32, i32) {
    %c0_i32 = arith.constant 0 : i32
    %c0_i32_0 = arith.constant 0 : i32
    return %c0_i32, %arg0 : i32, i32
  }
  func.func @transform_3(%arg0: i32, %arg1: i32) -> (i32, i32) {
    %c0_i32 = arith.constant 0 : i32
    return %arg1, %arg0 : i32, i32
  }
}

</mosaic_0001>

<bundles_post_ra>
// kernel: tpu_custom_call.1
= control target key start
LH: loop header
LB: loop body
LE: loop exit
PB: predicated region body
PF: predicated region fallthrough
CT: control target
= control target key end

     0   :  { %8 = vsyncpa [#allocation3], 0  ;;  %s537_s0 = inlined_call_operand.vmem [shape: bf16[64,32], index: 0, kind: input, shape index: {}]   ;;  %s538_s1 = inlined_call_operand.hbm [shape: bf16[32,512], index: 1, kind: input, shape index: {}]   ;;  %s539_s2 = inlined_call_operand.vmem [shape: f32[1,512], index: 2, kind: input, shape index: {}]   ;;  %s540_s3 = inlined_call_operand.hbm [shape: bf16[64,512], index: 3, kind: output, shape index: {}]  }
   0x1   :  { %9 = vsyncpa [#allocation4], 0  ;;  %s16_s14 = sshll.u32 %s538_s1, 4  ;;  %s430_s15 = smov [#allocation2]   ;;  %s17_s14 = int_to_ptr.hbm [resolvable:$true] %s16_s14 }
   0x2   :  { %s18_s16 = sshll.u32 %s430_s15, 4  ;;  %s431_s17 = smov 256   ;;  %s19_s16 = int_to_ptr.vmem [resolvable:$true] %s18_s16 }
   0x3   :  { %s432_s18 = smov 16  }
   0x4   :  { %24 = dma.hbm_to_vmem [thread:$0]  %s17_s14, 1024, %s19_s16, [#allocation3], %s431_s17, %s431_s17, %s432_s18  }
   0x5   :  { %426 = dma.done.wait [#allocation3], 1024  }
   0x6   :  { %427 = vsyncadd [#allocation3], 4294966272  ;;  %v332_v0 = vld [vmem:[#allocation2 + $0x20] sm:$0xf]  ;;  %v372_v1 = vld [vmem:[#allocation2 + $0x2c] sm:$0xf0] }
   0x7   :  { %v370_v2 = vld [vmem:[#allocation2 + $0x24] sm:$0xf]  ;;  %v333_v3 = vor.u32 %v372_v1, %v332_v0  ;;  %v334_v4 = vld [vmem:[#allocation2 + $0x30] sm:$0xf0]  ;;  %v340_v5 = vld [vmem:[#allocation2 + $0x28] sm:$0xf] }
   0x8   :  { %v373_v6 = vld [vmem:[#allocation2 + $0x34] sm:$0xf0]  ;;  %v337_v7 = vor.u32 %v370_v2, %v334_v4  ;;  %v371_v9 = vld [vmem:[#allocation2 + $0x2c] sm:$0xf]  ;;  %v342_v10 = vld [vmem:[#allocation2 + $0x38] sm:$0xf0] }
   0x9   :  { %v341_v8 = vor.u32 %v373_v6, %v340_v5  ;;  %v316_v11 = vld [vmem:[#allocation2] sm:$0xf]  ;;  %137 = vmatpush.bf16.msra.mxu0 %v333_v3  ;;  %v345_v12 = vor.u32 %v371_v9, %v342_v10  ;;  %v368_v13 = vld [vmem:[#allocation2 + $0xc] sm:$0xf0]  ;;  %v366_v14 = vld [vmem:[#allocation2 + $0x4] sm:$0xf] }
   0xa   :  { %v318_v15 = vld [vmem:[#allocation2 + $0x10] sm:$0xf0]  ;;  %166 = vmatpush.bf16.msra.mxu1 %v337_v7  ;;  %v317_v16 = vor.u32 %v368_v13, %v316_v11  ;;  %v324_v18 = vld [vmem:[#allocation2 + $0x8] sm:$0xf]  ;;  %v369_v19 = vld [vmem:[#allocation2 + $0x14] sm:$0xf0] }
   0xb   :  { %195 = vmatpush.bf16.msra.mxu2 %v341_v8  ;;  %v321_v17 = vor.u32 %v366_v14, %v318_v15  ;;  %v367_v20 = vld [vmem:[#allocation2 + $0xc] sm:$0xf]  ;;  %224 = vmatpush.bf16.msra.mxu3 %v345_v12  ;;  %v325_v21 = vor.u32 %v369_v19, %v324_v18  ;;  %v326_v22 = vld [vmem:[#allocation2 + $0x18] sm:$0xf0]  ;;  %v362_v24 = vld [vmem:[%s537_s0] sm:$0xff]  ;;  %vm118_vm0 = vcmask 261120  }
   0xc   :  { %v329_v23 = vor.u32 %v367_v20, %v326_v22  ;;  %v363_v25 = vld [vmem:[%s537_s0 + $0x8] sm:$0xff]  ;;  %v364_v26 = vld [vmem:[%s537_s0 + $0x10] sm:$0xff]  ;;  %v365_v27 = vld [vmem:[%s537_s0 + $0x18] sm:$0xff]  ;;  %s433_s0 = smov [#allocation5]   ;;  %s285_s30 = sshll.u32 %s540_s3, 4  ;;  %s286_s30 = int_to_ptr.hbm [resolvable:$true] %s285_s30 }
   0xd   :  { %138 = vmatpush.bf16.msra.mxu0 %v317_v16  ;;  %v48_v28 = vld [vmem:[%s539_s2] sm:$0xf]  ;;  %s283_s2 = sshll.u32 %s433_s0, 4  ;;  %s284_s2 = int_to_ptr.vmem [resolvable:$true] %s283_s2 }
   0xe   :  { %167 = vmatpush.bf16.msra.mxu1 %v321_v17  ;;  %v491_v29 = vperm.slane %v48_v28, 0  ;;  %v493_v30 = vperm.slane %v48_v28, 1  ;;  %v497_v36 = vperm.slane %v48_v28, 2  ;;  %v499_v37 = vperm.slane %v48_v28, 3 }
   0xf   :  { %196 = vmatpush.bf16.msra.mxu2 %v325_v21  ;;  %225 = vmatpush.bf16.msra.mxu3 %v329_v23 }
  0x10   :  { %346 = vmatmul.msk.bf16.vlgmr.msra.gmra.mxu0 %vm118_vm0, %v362_v24 }
  0x11   :  { %350 = vmatmul.msk.bf16.vlgmr.msra.gmra.mxu1 %vm118_vm0, %v362_v24 }
  0x12   :  { %354 = vmatmul.msk.bf16.vlgmr.msra.gmra.mxu2 %vm118_vm0, %v362_v24  ;;  %358 = vmatmul.msk.bf16.vlgmr.msra.gmra.mxu3 %vm118_vm0, %v362_v24 }
  0x20   :  { %347 = vmatmul.msk.bf16.gmra.mxu0 %vm118_vm0, %v363_v25 }
  0x21   :  { %351 = vmatmul.msk.bf16.gmra.mxu1 %vm118_vm0, %v363_v25 }
  0x22   :  { %355 = vmatmul.msk.bf16.gmra.mxu2 %vm118_vm0, %v363_v25  ;;  %359 = vmatmul.msk.bf16.gmra.mxu3 %vm118_vm0, %v363_v25 }
  0x30   :  { %348 = vmatmul.msk.bf16.gmra.mxu0 %vm118_vm0, %v364_v26 }
  0x31   :  { %352 = vmatmul.msk.bf16.gmra.mxu1 %vm118_vm0, %v364_v26 }
  0x32   :  { %356 = vmatmul.msk.bf16.gmra.mxu2 %vm118_vm0, %v364_v26  ;;  %360 = vmatmul.msk.bf16.gmra.mxu3 %vm118_vm0, %v364_v26 }
  0x40   :  { %349 = vmatmul.msk.bf16.gmra.mxu0 %vm118_vm0, %v365_v27 }
  0x41   :  { %353 = vmatmul.msk.bf16.gmra.mxu1 %vm118_vm0, %v365_v27 }
  0x42   :  { %357 = vmatmul.msk.bf16.gmra.mxu2 %vm118_vm0, %v365_v27  ;;  %361 = vmatmul.msk.bf16.gmra.mxu3 %vm118_vm0, %v365_v27 }
  0x8d   :  { %v140_v31 = vpop.f32.mrf.mxu0 }
  0x8e   :  { %v141_v32 = vadd.f32 %v140_v31, %v491_v29  ;;  %v169_v33 = vpop.f32.mrf.mxu1 }
  0x8f   :  { %v170_v34 = vadd.f32 %v169_v33, %v493_v30 }
  0x91   :  { %v247_v35 = vpack.c.bf16 %v170_v34, %v141_v32 }
  0x93   :  { %263 = vst [vmem:[#allocation5] sm:$0xff] %v247_v35 }
  0x95   :  { %v198_v38 = vpop.f32.mrf.mxu2  ;;  %v227_v40 = vpop.f32.mrf.mxu3 }
  0x96   :  { %v199_v39 = vadd.f32 %v198_v38, %v497_v36  ;;  %v142_v41 = vpop.f32.mrf.mxu0  ;;  %v228_v42 = vadd.f32 %v227_v40, %v499_v37  ;;  %v171_v44 = vpop.f32.mrf.mxu1 }
  0x97   :  { %v143_v43 = vadd.f32 %v142_v41, %v491_v29  ;;  %v172_v45 = vadd.f32 %v171_v44, %v493_v30 }
  0x98   :  { %v248_v46 = vpack.c.bf16 %v228_v42, %v199_v39 }
  0x99   :  { %v249_v47 = vpack.c.bf16 %v172_v45, %v143_v43 }
  0x9a   :  { %264 = vst [vmem:[#allocation5 + $0x8] sm:$0xff] %v248_v46 }
  0x9b   :  { %265 = vst [vmem:[#allocation5 + $0x10] sm:$0xff] %v249_v47 }
  0x9d   :  { %v200_v48 = vpop.f32.mrf.mxu2  ;;  %v229_v50 = vpop.f32.mrf.mxu3 }
  0x9e   :  { %v201_v49 = vadd.f32 %v200_v48, %v497_v36  ;;  %v145_v51 = vpop.f32.mrf.mxu0  ;;  %v230_v52 = vadd.f32 %v229_v50, %v499_v37  ;;  %v174_v54 = vpop.f32.mrf.mxu1 }
  0x9f   :  { %v146_v53 = vadd.f32 %v145_v51, %v491_v29  ;;  %v175_v55 = vadd.f32 %v174_v54, %v493_v30 }
  0xa0   :  { %v250_v56 = vpack.c.bf16 %v230_v52, %v201_v49 }
  0xa1   :  { %v251_v57 = vpack.c.bf16 %v175_v55, %v146_v53 }
  0xa2   :  { %266 = vst [vmem:[#allocation5 + $0x18] sm:$0xff] %v250_v56 }
  0xa3   :  { %267 = vst [vmem:[#allocation5 + $0x20] sm:$0xff] %v251_v57 }
  0xa5   :  { %v203_v58 = vpop.f32.mrf.mxu2  ;;  %v232_v60 = vpop.f32.mrf.mxu3 }
  0xa6   :  { %v204_v59 = vadd.f32 %v203_v58, %v497_v36  ;;  %v147_v61 = vpop.f32.mrf.mxu0  ;;  %v233_v62 = vadd.f32 %v232_v60, %v499_v37  ;;  %v176_v0 = vpop.f32.mrf.mxu1 }
  0xa7   :  { %v148_v63 = vadd.f32 %v147_v61, %v491_v29  ;;  %v177_v1 = vadd.f32 %v176_v0, %v493_v30 }
  0xa8   :  { %v252_v2 = vpack.c.bf16 %v233_v62, %v204_v59 }
  0xa9   :  { %v253_v3 = vpack.c.bf16 %v177_v1, %v148_v63 }
  0xaa   :  { %268 = vst [vmem:[#allocation5 + $0x28] sm:$0xff] %v252_v2 }
  0xab   :  { %269 = vst [vmem:[#allocation5 + $0x30] sm:$0xff] %v253_v3 }
  0xad   :  { %v205_v4 = vpop.f32.mrf.mxu2  ;;  %v234_v6 = vpop.f32.mrf.mxu3 }
  0xae   :  { %v206_v5 = vadd.f32 %v205_v4, %v497_v36  ;;  %v150_v7 = vpop.f32.mrf.mxu0  ;;  %v235_v8 = vadd.f32 %v234_v6, %v499_v37  ;;  %v179_v10 = vpop.f32.mrf.mxu1 }
  0xaf   :  { %v151_v9 = vadd.f32 %v150_v7, %v491_v29  ;;  %v180_v11 = vadd.f32 %v179_v10, %v493_v30 }
  0xb0   :  { %v254_v12 = vpack.c.bf16 %v235_v8, %v206_v5 }
  0xb1   :  { %v255_v13 = vpack.c.bf16 %v180_v11, %v151_v9 }
  0xb2   :  { %270 = vst [vmem:[#allocation5 + $0x38] sm:$0xff] %v254_v12 }
  0xb3   :  { %271 = vst [vmem:[#allocation5 + $0x40] sm:$0xff] %v255_v13 }
  0xb5   :  { %v208_v14 = vpop.f32.mrf.mxu2  ;;  %v237_v16 = vpop.f32.mrf.mxu3 }
  0xb6   :  { %v209_v15 = vadd.f32 %v208_v14, %v497_v36  ;;  %v152_v17 = vpop.f32.mrf.mxu0  ;;  %v238_v18 = vadd.f32 %v237_v16, %v499_v37  ;;  %v181_v20 = vpop.f32.mrf.mxu1 }
  0xb7   :  { %v153_v19 = vadd.f32 %v152_v17, %v491_v29  ;;  %v182_v21 = vadd.f32 %v181_v20, %v493_v30 }
  0xb8   :  { %v256_v22 = vpack.c.bf16 %v238_v18, %v209_v15 }
  0xb9   :  { %v257_v23 = vpack.c.bf16 %v182_v21, %v153_v19 }
  0xba   :  { %272 = vst [vmem:[#allocation5 + $0x48] sm:$0xff] %v256_v22 }
  0xbb   :  { %273 = vst [vmem:[#allocation5 + $0x50] sm:$0xff] %v257_v23 }
  0xbd   :  { %v210_v24 = vpop.f32.mrf.mxu2  ;;  %v239_v26 = vpop.f32.mrf.mxu3 }
  0xbe   :  { %v211_v25 = vadd.f32 %v210_v24, %v497_v36  ;;  %v155_v27 = vpop.f32.mrf.mxu0  ;;  %v240_v28 = vadd.f32 %v239_v26, %v499_v37  ;;  %v184_v32 = vpop.f32.mrf.mxu1 }
  0xbf   :  { %v156_v31 = vadd.f32 %v155_v27, %v491_v29  ;;  %v185_v33 = vadd.f32 %v184_v32, %v493_v30 }
  0xc0   :  { %v258_v34 = vpack.c.bf16 %v240_v28, %v211_v25 }
  0xc1   :  { %v259_v35 = vpack.c.bf16 %v185_v33, %v156_v31 }
  0xc2   :  { %274 = vst [vmem:[#allocation5 + $0x58] sm:$0xff] %v258_v34 }
  0xc3   :  { %275 = vst [vmem:[#allocation5 + $0x60] sm:$0xff] %v259_v35 }
  0xc5   :  { %v213_v38 = vpop.f32.mrf.mxu2  ;;  %v242_v40 = vpop.f32.mrf.mxu3 }
  0xc6   :  { %v214_v39 = vadd.f32 %v213_v38, %v497_v36  ;;  %v157_v41 = vpop.f32.mrf.mxu0  ;;  %v243_v42 = vadd.f32 %v242_v40, %v499_v37  ;;  %v186_v44 = vpop.f32.mrf.mxu1 }
  0xc7   :  { %v158_v43 = vadd.f32 %v157_v41, %v491_v29  ;;  %v187_v45 = vadd.f32 %v186_v44, %v493_v30 }
  0xc8   :  { %v260_v46 = vpack.c.bf16 %v243_v42, %v214_v39 }
  0xc9   :  { %v261_v47 = vpack.c.bf16 %v187_v45, %v158_v43 }
  0xca   :  { %276 = vst [vmem:[#allocation5 + $0x68] sm:$0xff] %v260_v46 }
  0xcb   :  { %277 = vst [vmem:[#allocation5 + $0x70] sm:$0xff] %v261_v47 }
  0xcd   :  { %v215_v48 = vpop.f32.mrf.mxu2  ;;  %v244_v50 = vpop.f32.mrf.mxu3 }
  0xce   :  { %v216_v49 = vadd.f32 %v215_v48, %v497_v36  ;;  %v245_v51 = vadd.f32 %v244_v50, %v499_v37 }
  0xd0   :  { %v262_v29 = vpack.c.bf16 %v245_v51, %v216_v49 }
  0xd2   :  { %278 = vst [vmem:[#allocation5 + $0x78] sm:$0xff] %v262_v29 }
  0xd3   :  { %291 = dma.vmem_to_hbm [thread:$0]  %s284_s2, 2048, %s286_s30, [#allocation4], %s431_s17, %s431_s17, %s432_s18  }
  0xd4   :  { %428 = dma.done.wait [#allocation4], 2048  }
  0xd5   :  { %429 = vsyncadd [#allocation4], 4294965248 }
  0xd6   :  { %296 = vsyncpa [#allocation3], 1 }
  0xd7   :  { %297 = vsyncpa [#allocation4], 1 }

</bundles_post_ra>
